<compile_context>
chip_gen: v6e
topology: v6e:2x2x1
jax: 0.10.0
libtpu: 0.0.40
codegen_flags: <defaults>
</compile_context>

<pallas_src>
import functools

import jax
import jax.numpy as jnp
from jax.experimental import pallas as pl
from jax.experimental.pallas import tpu as pltpu


def _round_up(n, m):
    return ((n + m - 1) // m) * m


def _mlp_kernel(x_ref, w1_ref, b1_ref, w2_ref, b2_ref, w3_ref, b3_ref, o_ref,
                *, eps):
    x = x_ref[...]
    # Bias rows, read once per grid step.
    b1 = b1_ref[...]
    b2 = b2_ref[...]
    b3 = b3_ref[...]

    # Layer 0: Linear(D, H1) + ReLU   (MXU, f32 accumulate)
    h1 = jnp.dot(x, w1_ref[...], preferred_element_type=jnp.float32)
    h1 = jnp.maximum(h1 + b1, 0.0)

    # Layer 1: Linear(H1, H2) + ReLU
    h2 = jnp.dot(h1, w2_ref[...], preferred_element_type=jnp.float32)
    h2 = jnp.maximum(h2 + b2, 0.0)

    # Output head Linear(H2, 1): an N=1 matmul wastes the MXU, so do it as a
    # VPU multiply + XLU lane reduction (w3_ref is a [1, H2] row).
    ff = jnp.sum(h2 * w3_ref[...], axis=-1, keepdims=True) + b3

    # Bounded output: -sigmoid(ff) * (1 + eps) + eps   (sigmoid -> EUP)
    out = -jax.nn.sigmoid(ff) * (1.0 + eps) + eps
    o_ref[...] = out.astype(o_ref.dtype)


def _choose_blocking(B, D, max_block):
    """Pick (block_b, grid) for the batch axis.

    * Lane-padding-aware VMEM cap: one x row costs round_up(D,128)*4 bytes in
      VMEM (not D*4).  Budget ~8 MiB for the double-buffered x window; the
      (block_b, 1) output double-buffer, hidden activations and resident
      weights fit in the remaining headroom under the explicit vmem limit.
    * Ragged grid: block_b need not divide B (last block is masked on
      writeback), so no wrapper-side padding / extra HBM copy of x.
    * v7x megacore: force >= 2 blocks (even count) for large B so the
      "parallel" batch axis shards evenly across both TensorCores.
    """
    if B <= 8:
        return B, 1  # single sub-8-row block == full array dim (legal)

    row_bytes = _round_up(D, 128) * 4
    vmem_cap_rows = max(8, (((8 * 2 ** 20) // (2 * row_bytes)) // 8) * 8)
    max_block = max(8, min(max_block, vmem_cap_rows))

    num_blocks = pl.cdiv(B, max_block)
    if B >= 1024:
        num_blocks = max(num_blocks, 2)          # use both v7x TensorCores
    if num_blocks > 1 and num_blocks % 2 == 1:
        num_blocks += 1                          # balanced 2-TC split
    block_b = min(max_block, _round_up(pl.cdiv(B, num_blocks), 8))
    grid = pl.cdiv(B, block_b)
    return block_b, grid


def ff_safety_value_function(x, params, *, eps=0.01, max_block=4096):
    """Pallas forward of FfSafetyValueFunction (bounded=True).

    x:       [B, input_size] float32 (any B >= 1)
    params:  dict with w1 [D, H1], b1 [1, H1], w2 [H1, H2], b2 [1, H2],
             w3 [H2, 1], b3 [1, 1]
    returns: [B, 1] float32
    """
    B, D = x.shape
    w1, b1 = params["w1"], params["b1"]
    w2, b2 = params["w2"], params["b2"]
    w3, b3 = params["w3"], params["b3"]
    H1 = w1.shape[1]
    H2 = w2.shape[1]
    w3_row = w3.reshape(1, H2)  # feed the head weight as a lane-major row

    block_b, grid = _choose_blocking(B, D, max_block)

    kernel = functools.partial(_mlp_kernel, eps=eps)

    # Weights/biases are small: keep the whole tensors resident for every
    # batch tile (block index (0,0) every step -> no per-step re-DMA).
    def full(shape):
        return pl.BlockSpec(shape, lambda i: (0, 0))

    out = pl.pallas_call(
        kernel,
        out_shape=jax.ShapeDtypeStruct((B, 1), jnp.float32),
        grid_spec=pltpu.PrefetchScalarGridSpec(
            num_scalar_prefetch=0,
            grid=(grid,),
            in_specs=[
                pl.BlockSpec((block_b, D), lambda i: (i, 0)),  # x tile (ragged last block)
                full((D, H1)),   # w1
                full((1, H1)),   # b1
                full((H1, H2)),  # w2
                full((1, H2)),   # b2
                full((1, H2)),   # w3 (row layout)
                full((1, 1)),    # b3
            ],
            out_specs=pl.BlockSpec((block_b, 1), lambda i: (i, 0)),
        ),
        compiler_params=pltpu.CompilerParams(
            dimension_semantics=("parallel",),
            # Explicit limit: above v5e's 16 MiB default scoped VMEM, well
            # under v7x's 64 MiB physical VMEM per TensorCore.
            vmem_limit_bytes=40 * 2 ** 20,
        ),
    )(x, w1, b1, w2, b2, w3_row, b3)

    return out


def init_params(key, input_size, layers=(64, 64)):
    """Deterministic init mimicking nn.Linear default (uniform +/- 1/sqrt(fan_in))."""
    dims = [input_size] + list(layers) + [1]
    params = {}
    ks = jax.random.split(key, 2 * (len(dims) - 1))
    for i in range(len(dims) - 1):
        fan_in, fan_out = dims[i], dims[i + 1]
        bound = 1.0 / jnp.sqrt(fan_in)
        w = jax.random.uniform(ks[2 * i], (fan_in, fan_out),
                               minval=-bound, maxval=bound, dtype=jnp.float32)
        b = jax.random.uniform(ks[2 * i + 1], (1, fan_out),
                               minval=-bound, maxval=bound, dtype=jnp.float32)
        params[f"w{i + 1}"] = w
        params[f"b{i + 1}"] = b
    return params


def _reference_forward(x, params, eps=0.01):
    h1 = jnp.maximum(x @ params["w1"] + params["b1"], 0.0)
    h2 = jnp.maximum(h1 @ params["w2"] + params["b2"], 0.0)
    ff = h2 @ params["w3"] + params["b3"]
    return -jax.nn.sigmoid(ff) * (1.0 + eps) + eps


if __name__ == "__main__":
    key = jax.random.PRNGKey(0)
    k_param, k_x, k_x2, k_x3 = jax.random.split(key, 4)

    input_size = 32
    params = init_params(k_param, input_size, layers=(64, 64))

    # Small batch: single block, no ragged boundary.
    x_small = jax.random.normal(k_x, (16, input_size), dtype=jnp.float32)
    out_small = jax.block_until_ready(
        ff_safety_value_function(x_small, params, eps=0.01))
    ref_small = _reference_forward(x_small, params, eps=0.01)
    assert out_small.shape == (16, 1)
    assert jnp.allclose(out_small, ref_small, atol=1e-5, rtol=1e-5), \
        "small-batch mismatch vs reference"

    # Ragged small batch (not a multiple of 8): exercises a masked boundary
    # block with garbage tail rows that must never leak into valid outputs.
    x_ragged = jax.random.normal(k_x3, (13, input_size), dtype=jnp.float32)
    out_ragged = jax.block_until_ready(
        ff_safety_value_function(x_ragged, params, eps=0.01))
    ref_ragged = _reference_forward(x_ragged, params, eps=0.01)
    assert out_ragged.shape == (13, 1)
    assert jnp.allclose(out_ragged, ref_ragged, atol=1e-5, rtol=1e-5), \
        "ragged-batch mismatch vs reference"

    # Larger, non-multiple batch: exercises the >=2-block even grid (sharded
    # across TensorCores on v7x) with a ragged last block and no jnp.pad copy.
    x_big = jax.random.normal(k_x2, (2050, input_size), dtype=jnp.float32)
    out_big = jax.block_until_ready(
        ff_safety_value_function(x_big, params, eps=0.01))
    ref_big = _reference_forward(x_big, params, eps=0.01)
    assert out_big.shape == (2050, 1)
    assert jnp.allclose(out_big, ref_big, atol=1e-5, rtol=1e-5), \
        "large-batch mismatch vs reference"

    # Bounded-output sanity: values lie in (-1, eps).
    assert bool(jnp.all(out_big > -1.0)) and bool(jnp.all(out_big < 0.01 + 1e-6))
    assert bool(jnp.all(jnp.isfinite(out_big)))

    print("KERNEL_OK")
</pallas_src>

<mosaic_0001>
module attributes {stable_mosaic.version = 11 : i64} {
  func.func @_mlp_kernel(%arg0: i32, %arg1: memref<16x32xf32, #tpu.memory_space<vmem>>, %arg2: memref<32x64xf32, #tpu.memory_space<vmem>>, %arg3: memref<1x64xf32, #tpu.memory_space<vmem>>, %arg4: memref<64x64xf32, #tpu.memory_space<vmem>>, %arg5: memref<1x64xf32, #tpu.memory_space<vmem>>, %arg6: memref<1x64xf32, #tpu.memory_space<vmem>>, %arg7: memref<1x1xf32, #tpu.memory_space<vmem>>, %arg8: memref<16x1xf32, #tpu.memory_space<vmem>>) attributes {dimension_semantics = [#tpu.dimension_semantics<parallel>], iteration_bounds = array<i64: 1>, scalar_prefetch = 0 : i64, scratch_operands = 0 : i64, tpu.core_type = #tpu.core_type<tc>, window_params = [{transform_indices = @transform_0, window_bounds = array<i64: 16, 32>}, {pipeline_mode = #tpu.pipeline_mode<synchronous>, transform_indices = @transform_1, window_bounds = array<i64: 32, 64>}, {pipeline_mode = #tpu.pipeline_mode<synchronous>, transform_indices = @transform_2, window_bounds = array<i64: 1, 64>}, {pipeline_mode = #tpu.pipeline_mode<synchronous>, transform_indices = @transform_3, window_bounds = array<i64: 64, 64>}, {pipeline_mode = #tpu.pipeline_mode<synchronous>, transform_indices = @transform_4, window_bounds = array<i64: 1, 64>}, {pipeline_mode = #tpu.pipeline_mode<synchronous>, transform_indices = @transform_5, window_bounds = array<i64: 1, 64>}, {pipeline_mode = #tpu.pipeline_mode<synchronous>, transform_indices = @transform_6, window_bounds = array<i64: 1, 1>}, {transform_indices = @transform_7, window_bounds = array<i64: 16, 1>}]} {
    %c0 = arith.constant 0 : index
    %c0_0 = arith.constant 0 : index
    %0 = vector.load %arg1[%c0, %c0_0] : memref<16x32xf32, #tpu.memory_space<vmem>>, vector<16x32xf32>
    %c0_1 = arith.constant 0 : index
    %c0_2 = arith.constant 0 : index
    %1 = vector.load %arg3[%c0_1, %c0_2] : memref<1x64xf32, #tpu.memory_space<vmem>>, vector<1x64xf32>
    %c0_3 = arith.constant 0 : index
    %c0_4 = arith.constant 0 : index
    %2 = vector.load %arg5[%c0_3, %c0_4] : memref<1x64xf32, #tpu.memory_space<vmem>>, vector<1x64xf32>
    %c0_5 = arith.constant 0 : index
    %c0_6 = arith.constant 0 : index
    %3 = vector.load %arg7[%c0_5, %c0_6] : memref<1x1xf32, #tpu.memory_space<vmem>>, vector<1x1xf32>
    %c0_7 = arith.constant 0 : index
    %c0_8 = arith.constant 0 : index
    %4 = vector.load %arg2[%c0_7, %c0_8] : memref<32x64xf32, #tpu.memory_space<vmem>>, vector<32x64xf32>
    %cst = arith.constant dense<0.000000e+00> : vector<16x64xf32>
    %5 = tpu.matmul %0, %4, %cst {dimension_numbers = #tpu.dot_dimension_numbers<[1], [0], [0], [1], [0, 0, 1, 1], [], []>} : vector<16x32xf32>, vector<32x64xf32>, vector<16x64xf32> -> vector<16x64xf32>
    %6 = vector.broadcast %1 : vector<1x64xf32> to vector<16x64xf32>
    %7 = arith.addf %5, %6 : vector<16x64xf32>
    %cst_9 = arith.constant 0.000000e+00 : f32
    %8 = vector.broadcast %cst_9 : f32 to vector<16x64xf32>
    %9 = arith.maximumf %7, %8 : vector<16x64xf32>
    %c0_10 = arith.constant 0 : index
    %c0_11 = arith.constant 0 : index
    %10 = vector.load %arg4[%c0_10, %c0_11] : memref<64x64xf32, #tpu.memory_space<vmem>>, vector<64x64xf32>
    %cst_12 = arith.constant dense<0.000000e+00> : vector<16x64xf32>
    %11 = tpu.matmul %9, %10, %cst_12 {dimension_numbers = #tpu.dot_dimension_numbers<[1], [0], [0], [1], [0, 0, 1, 1], [], []>} : vector<16x64xf32>, vector<64x64xf32>, vector<16x64xf32> -> vector<16x64xf32>
    %12 = vector.broadcast %2 : vector<1x64xf32> to vector<16x64xf32>
    %13 = arith.addf %11, %12 : vector<16x64xf32>
    %cst_13 = arith.constant 0.000000e+00 : f32
    %14 = vector.broadcast %cst_13 : f32 to vector<16x64xf32>
    %15 = arith.maximumf %13, %14 : vector<16x64xf32>
    %c0_14 = arith.constant 0 : index
    %c0_15 = arith.constant 0 : index
    %16 = vector.load %arg6[%c0_14, %c0_15] : memref<1x64xf32, #tpu.memory_space<vmem>>, vector<1x64xf32>
    %17 = vector.broadcast %16 : vector<1x64xf32> to vector<16x64xf32>
    %18 = arith.mulf %15, %17 : vector<16x64xf32>
    %cst_16 = arith.constant dense<0.000000e+00> : vector<16xf32>
    %19 = vector.multi_reduction <add>, %18, %cst_16 [1] : vector<16x64xf32> to vector<16xf32>
    %20 = vector.shape_cast %19 : vector<16xf32> to vector<16x1xf32>
    %21 = vector.broadcast %3 : vector<1x1xf32> to vector<16x1xf32>
    %22 = arith.addf %20, %21 : vector<16x1xf32>
    %23 = arith.negf %22 : vector<16x1xf32>
    %24 = math.exp %23 : vector<16x1xf32>
    %cst_17 = arith.constant 1.000000e+00 : f32
    %25 = vector.broadcast %cst_17 : f32 to vector<16x1xf32>
    %26 = arith.addf %25, %24 : vector<16x1xf32>
    %27 = arith.divf %25, %26 : vector<16x1xf32>
    %cst_18 = arith.constant 0.000000e+00 : f32
    %28 = vector.broadcast %cst_18 : f32 to vector<16x1xf32>
    %29 = arith.subf %28, %27 : vector<16x1xf32>
    %cst_19 = arith.constant 1.010000e+00 : f32
    %30 = vector.broadcast %cst_19 : f32 to vector<16x1xf32>
    %31 = arith.mulf %29, %30 : vector<16x1xf32>
    %cst_20 = arith.constant 0.00999999977 : f32
    %32 = vector.broadcast %cst_20 : f32 to vector<16x1xf32>
    %33 = arith.addf %31, %32 : vector<16x1xf32>
    %c0_21 = arith.constant 0 : index
    %c0_22 = arith.constant 0 : index
    %34 = vector.load %arg8[%c0_21, %c0_22] : memref<16x1xf32, #tpu.memory_space<vmem>>, vector<16x1xf32>
    tpu.vector_store %arg8[%c0_21, %c0_22], %33 {strides = array<i32>} : memref<16x1xf32, #tpu.memory_space<vmem>>, vector<16x1xf32>,
    return
  }
  func.func @transform_0(%arg0: i32) -> (i32, i32) {
    %c0_i32 = arith.constant 0 : i32
    %c0_i32_0 = arith.constant 0 : i32
    return %arg0, %c0_i32 : i32, i32
  }
  func.func @transform_1(%arg0: i32) -> (i32, i32) {
    %c0_i32 = arith.constant 0 : i32
    %c0_i32_0 = arith.constant 0 : i32
    %c0_i32_1 = arith.constant 0 : i32
    return %c0_i32, %c0_i32_0 : i32, i32
  }
  func.func @transform_2(%arg0: i32) -> (i32, i32) {
    %c0_i32 = arith.constant 0 : i32
    %c0_i32_0 = arith.constant 0 : i32
    %c0_i32_1 = arith.constant 0 : i32
    return %c0_i32, %c0_i32_0 : i32, i32
  }
  func.func @transform_3(%arg0: i32) -> (i32, i32) {
    %c0_i32 = arith.constant 0 : i32
    %c0_i32_0 = arith.constant 0 : i32
    %c0_i32_1 = arith.constant 0 : i32
    return %c0_i32, %c0_i32_0 : i32, i32
  }
  func.func @transform_4(%arg0: i32) -> (i32, i32) {
    %c0_i32 = arith.constant 0 : i32
    %c0_i32_0 = arith.constant 0 : i32
    %c0_i32_1 = arith.constant 0 : i32
    return %c0_i32, %c0_i32_0 : i32, i32
  }
  func.func @transform_5(%arg0: i32) -> (i32, i32) {
    %c0_i32 = arith.constant 0 : i32
    %c0_i32_0 = arith.constant 0 : i32
    %c0_i32_1 = arith.constant 0 : i32
    return %c0_i32, %c0_i32_0 : i32, i32
  }
  func.func @transform_6(%arg0: i32) -> (i32, i32) {
    %c0_i32 = arith.constant 0 : i32
    %c0_i32_0 = arith.constant 0 : i32
    %c0_i32_1 = arith.constant 0 : i32
    return %c0_i32, %c0_i32_0 : i32, i32
  }
  func.func @transform_7(%arg0: i32) -> (i32, i32) {
    %c0_i32 = arith.constant 0 : i32
    %c0_i32_0 = arith.constant 0 : i32
    return %arg0, %c0_i32 : i32, i32
  }
}

</mosaic_0001>

<bundles_post_ra>
// kernel: tpu_custom_call.1
= control target key start
LH: loop header
LB: loop body
LE: loop exit
PB: predicated region body
PF: predicated region fallthrough
CT: control target
= control target key end

     0   :  { %s527_s0 = inlined_call_operand.hbm [shape: f32[16,32], index: 0, kind: input, shape index: {}]   ;;  %s528_s1 = inlined_call_operand.hbm [shape: f32[32,64], index: 1, kind: input, shape index: {}]   ;;  %s529_s2 = inlined_call_operand.vmem [shape: f32[1,64], index: 2, kind: input, shape index: {}]   ;;  %s530_s3 = inlined_call_operand.hbm [shape: f32[64,64], index: 3, kind: input, shape index: {}]   ;;  %s531_s4 = inlined_call_operand.vmem [shape: f32[1,64], index: 4, kind: input, shape index: {}]   ;;  %s532_s5 = inlined_call_operand.vmem [shape: f32[1,64], index: 5, kind: input, shape index: {}]   ;;  %s533_s6 = inlined_call_operand.<no memory space> [shape: f32[1,1], index: 6, kind: input, shape index: {}]   ;;  %s534_s7 = inlined_call_operand.vmem [shape: f32[16,1], index: 7, kind: output, shape index: {}]  }
   0x1   :  { %v12_v0 = vstv %s533_s6 }
   0x2   :  { %13 = vst [vmem:[#allocation2] sm:$0x1] %v12_v0 }
   0x3   :  { %14 = vsyncpa [#allocation4], 0 }
   0x4   :  { %15 = vsyncpa [#allocation6], 0  ;;  %s449_s26 = smov [#allocation5]   ;;  %s450_s28 = smov [#allocation3]  }
   0x5   :  { %s33_s27 = sshll.u32 %s449_s26, 4  ;;  %s21_s29 = sshll.u32 %s450_s28, 4  ;;  %s34_s27 = int_to_ptr.vmem [resolvable:$true] %s33_s27  ;;  %s22_s29 = int_to_ptr.vmem [resolvable:$true] %s21_s29 }
   0x6   :  { %s393_s30 = scalar_lea.vmem %s34_s27, 512  ;;  %p398_p1 = scmp.lt.s32.totalorder %s34_s27, %s34_s27 }
   0x7   :  { %p394_p0 = scmp.ne.s32.totalorder %s34_s27, %s393_s30  ;;  %p399_p2 = scmp.lt.s32.totalorder %s393_s30, %s393_s30 }
   0x9   :  { %p400_p3 = por %p399_p2, %p398_p1 }
   0xb   :  { %p401_p4 = pnand %p400_p3, %p394_p0 }
   0xd   :  { %404 = shalt.err (!%p401_p4)
}
   0xe   :  { %s451_s8 = smov 128   ;;  %s452_s9 = smov 8  }
   0xf   :  { %39 = dma.hbm_to_vmem [thread:$0]  %s528_s1, 512, %s34_s27, [#allocation6], %s451_s8, %s451_s8, %s452_s9  }
  0x10   :  { %s413_s11 = scalar_lea.vmem %s22_s29, 256  ;;  %p418_p6 = scmp.lt.s32.totalorder %s22_s29, %s22_s29 }
  0x11   :  { %p414_p5 = scmp.ne.s32.totalorder %s22_s29, %s413_s11  ;;  %p419_p7 = scmp.lt.s32.totalorder %s413_s11, %s413_s11 }
  0x13   :  { %p420_p8 = por %p419_p7, %p418_p6 }
  0x15   :  { %p421_p9 = pnand %p420_p8, %p414_p5 }
  0x17   :  { %424 = shalt.err (!%p421_p9)
}
  0x18   :  { %27 = dma.hbm_to_vmem [thread:$0]  %s527_s0, 256, %s22_s29, [#allocation4], %s451_s8, %s451_s8, %s452_s9  }
  0x19   :  { %s453_s14 = smov [#allocation7]  }
  0x1a   :  { %s47_s15 = sshll.u32 %s453_s14, 4  ;;  %s48_s15 = int_to_ptr.vmem [resolvable:$true] %s47_s15 }
  0x1b   :  { %s433_s16 = scalar_lea.vmem %s48_s15, 1024  ;;  %p438_p11 = scmp.lt.s32.totalorder %s48_s15, %s48_s15 }
  0x1c   :  { %p434_p10 = scmp.ne.s32.totalorder %s48_s15, %s433_s16  ;;  %p439_p12 = scmp.lt.s32.totalorder %s433_s16, %s433_s16 }
  0x1e   :  { %p440_p13 = por %p439_p12, %p438_p11 }
  0x20   :  { %p441_p0 = pnand %p440_p13, %p434_p10 }
  0x22   :  { %444 = shalt.err (!%p441_p0)
}
  0x23   :  { %53 = dma.hbm_to_vmem [thread:$0]  %s530_s3, 1024, %s48_s15, [#allocation6], %s451_s8, %s451_s8, %s452_s9  }
  0x24   :  { %445 = dma.done.wait [#allocation4], 256  }
  0x25   :  { %446 = vsyncadd [#allocation4], 4294967040 }
  0x26   :  { %447 = dma.done.wait [#allocation6], 1536  }
  0x27   :  { %448 = vsyncadd [#allocation6], 4294965760  ;;  %vm84_vm0 = vcmask 261120   ;;  %v77_v1 = vld [vmem:[#allocation5 + $0x18] sm:$0xff]  ;;  %v76_v2 = vld [vmem:[#allocation5 + $0x10] sm:$0xff]  ;;  %vm182_vm1 = vcmask 523264  }
  0x28   :  { %342 = vmatprep.subr.mxu0 %v77_v1  ;;  %v69_v3 = vld [vmem:[#allocation3] sm:$0xff]  ;;  %v75_v4 = vld [vmem:[#allocation5 + $0x8] sm:$0xff]  ;;  %v175_v5 = vld [vmem:[#allocation7 + $0x38] sm:$0xff]  ;;  %vm307_vm2 = vcmask 7168  }
  0x29   :  { %343 = vmatpush3.msra.mxu0 %v77_v1  ;;  %350 = vmatprep.mubr.msk.f32.mxu0 %vm84_vm0, %v69_v3  ;;  %v174_v6 = vld [vmem:[#allocation7 + $0x30] sm:$0xff]  ;;  %v74_v7 = vld [vmem:[#allocation5] sm:$0xff]  ;;  %v173_v8 = vld [vmem:[#allocation7 + $0x28] sm:$0xff] }
  0x2a   :  { %344 = vmatprep.subr.mxu0 %v76_v2  ;;  %353 = vmatprep.subr.mxu1 %v175_v5  ;;  %v70_v9 = vld [vmem:[#allocation3 + $0x8] sm:$0xff]  ;;  %v172_v10 = vld [vmem:[#allocation7 + $0x20] sm:$0xff]  ;;  %v170_v12 = vld [vmem:[#allocation7 + $0x10] sm:$0xff] }
  0x2b   :  { %345 = vmatpush3.msra.mxu0 %v76_v2  ;;  %354 = vmatpush3.msra.mxu1 %v175_v5  ;;  %v171_v11 = vld [vmem:[#allocation7 + $0x18] sm:$0xff]  ;;  %v169_v13 = vld [vmem:[#allocation7 + $0x8] sm:$0xff]  ;;  %v168_v14 = vld [vmem:[#allocation7] sm:$0xff] }
  0x2c   :  { %346 = vmatprep.subr.mxu0 %v75_v4  ;;  %355 = vmatprep.subr.mxu1 %v174_v6  ;;  %v316_v15 = vld [vmem:[%s529_s2] ss:$0 sm:$0xff] }
  0x2d   :  { %347 = vmatpush3.msra.mxu0 %v75_v4  ;;  %356 = vmatpush3.msra.mxu1 %v174_v6  ;;  %v319_v22 = vld [vmem:[%s531_s4] ss:$0 sm:$0xff] }
  0x2e   :  { %348 = vmatprep.subr.mxu0 %v74_v7  ;;  %357 = vmatprep.subr.mxu1 %v173_v8  ;;  %v322_v29 = vld [vmem:[%s532_s5] ss:$0 sm:$0xff] }
  0x2f   :  { %349 = vmatpush3.msra.mxu0 %v74_v7  ;;  %358 = vmatpush3.msra.mxu1 %v173_v8  ;;  %v323_v34 = vld [vmem:[#allocation2] ss:$0 sm:$0xff] }
  0x30   :  { %351 = vmatmul.mubr.msk.f32.vlgmr.msra.gmra.mxu0 %vm84_vm0, %v70_v9  ;;  %359 = vmatprep.subr.mxu1 %v172_v10 }
  0x31   :  { %360 = vmatpush3.msra.mxu1 %v172_v10 }
  0x32   :  { %361 = vmatprep.subr.mxu1 %v171_v11 }
  0x33   :  { %362 = vmatpush3.msra.mxu1 %v171_v11 }
  0x34   :  { %363 = vmatprep.subr.mxu1 %v170_v12 }
  0x35   :  { %364 = vmatpush3.msra.mxu1 %v170_v12 }
  0x36   :  { %365 = vmatprep.subr.mxu1 %v169_v13 }
  0x37   :  { %366 = vmatpush3.msra.mxu1 %v169_v13 }
  0x38   :  { %367 = vmatprep.subr.mxu1 %v168_v14 }
  0x39   :  { %368 = vmatpush3.msra.mxu1 %v168_v14 }
  0xf0   :  { %v352_v16 = vpop.f32.mrf.mxu0 }
  0xf1   :  { %v163_v17 = vadd.f32 %v352_v16, %v316_v15 }
  0xf2   :  { %v157_v18 = vpop.f32.mrf.mxu0 }
  0xf3   :  { %v158_v19 = vadd.f32 %v316_v15, %v157_v18  ;;  %v167_v21 = vmax.f32 %v163_v17, 0.0 }
  0xf5   :  { %v166_v20 = vmax.f32 %v158_v19, 0.0 }
  0xf7   :  { %369 = vmatprep.mubr.msk.f32.mxu1 %vm182_vm1, %v166_v20 }
  0xf8   :  { %370 = vmatmul.mubr.msk.f32.vlgmr.msra.gmra.mxu1 %vm182_vm1, %v167_v21 }
 0x1b8   :  { %v371_v23 = vpop.f32.mrf.mxu1 }
 0x1b9   :  { %v261_v24 = vadd.f32 %v371_v23, %v319_v22 }
 0x1ba   :  { %v255_v25 = vpop.f32.mrf.mxu1 }
 0x1bb   :  { %v256_v26 = vadd.f32 %v319_v22, %v255_v25  ;;  %v265_v27 = vmax.f32 %v261_v24, 0.0 }
 0x1bd   :  { %v264_v28 = vmax.f32 %v256_v26, 0.0  ;;  %v274_v32 = vmul.f32 %v322_v29, %v265_v27 }
 0x1bf   :  { %v273_v30 = vmul.f32 %v322_v29, %v264_v28  ;;  %v278_v33 = vsel %vm182_vm1, %v274_v32, 0.0 }
 0x1c1   :  { %v275_v31 = vsel %vm182_vm1, %v273_v30, 0.0 }
 0x1c2   :  { %276 = vadd.xlane.f32.xlu0 %v275_v31 }
 0x1c6   :  { %279 = vadd.xlane.f32.xlu0 %v278_v33 }
 0x24b   :  { %v277_v35 = vpop.xlane.xlu0 %276 }
 0x24c   :  { %v287_v36 = vadd.f32 %v323_v34, %v277_v35 }
 0x24e   :  { %v324_v37 = vmul.f32 -1.442695, %v287_v36 }
 0x24f   :  { %v280_v38 = vpop.xlane.xlu0 %279 }
 0x250   :  { %377 = vpow2.f32 %v324_v37  ;;  %v288_v39 = vadd.f32 %v323_v34, %v280_v38 }
 0x252   :  { %v325_v40 = vmul.f32 -1.442695, %v288_v39 }
 0x254   :  { %379 = vpow2.f32 %v325_v40 }
 0x25d   :  { %v378_v41 = vpop.eup %377 }
 0x25e   :  { %v295_v42 = vadd.f32 1.0, %v378_v41 }
 0x260   :  { %381 = vrcp.f32 %v295_v42 }
 0x261   :  { %v380_v43 = vpop.eup %379 }
 0x262   :  { %v296_v44 = vadd.f32 1.0, %v380_v43 }
 0x264   :  { %383 = vrcp.f32 %v296_v44 }
 0x26d   :  { %v382_v45 = vpop.eup %381 }
 0x26e   :  { %v301_v46 = vsub.f32 0.0, %v382_v45 }
 0x270   :  { %v303_v47 = vmul.f32 1.01, %v301_v46 }
 0x271   :  { %v384_v48 = vpop.eup %383 }
 0x272   :  { %v305_v49 = vadd.f32 0.01, %v303_v47  ;;  %v302_v50 = vsub.f32 0.0, %v384_v48 }
 0x274   :  { %308 = vst.msk [vmem:[%s534_s7] sm:$0xff] %vm307_vm2, %v305_v49  ;;  %v304_v51 = vmul.f32 1.01, %v302_v50 }
 0x276   :  { %v306_v52 = vadd.f32 0.01, %v304_v51 }
 0x278   :  { %309 = vst.msk [vmem:[%s534_s7 + $0x8] sm:$0xff] %vm307_vm2, %v306_v52 }
 0x279   :  { %314 = vsyncpa [#allocation4], 1 }
 0x27a   :  { %315 = vsyncpa [#allocation6], 1 }

</bundles_post_ra>
